<compile_context>
chip_gen: v7x
topology: tpu7x:2x2x1
jax: 0.10.0
libtpu: 0.0.40
codegen_flags: <defaults>
</compile_context>

<pallas_src>
import functools

import jax
import jax.numpy as jnp
from jax.experimental import pallas as pl
from jax.experimental.pallas import tpu as pltpu


def _triplet_loss_kernel(a_ref, p_ref, n_ref, o_ref, *, margin):
    a = a_ref[...].astype(jnp.float32)
    p = p_ref[...].astype(jnp.float32)
    n = n_ref[...].astype(jnp.float32)

    # Fused: pos_dist - neg_dist == sum((p - n) * (p + n - 2a), axis=1)
    diff = (p - n) * (p + n - 2.0 * a)
    per_sample = jnp.sum(diff, axis=1, keepdims=True)            # (tb, 1)
    o_ref[...] = jnp.maximum(per_sample + jnp.float32(margin), 0.0)


def _pick_block_rows(batch, dim, itemsize, target_block_bytes=4 * 1024 * 1024):
    """Rows per tile so one input block is ~target_block_bytes (2-8 MiB range)."""
    align = 8 if itemsize >= 4 else 16          # sublane multiple ((16,128) for bf16)
    tb = (target_block_bytes // max(dim * itemsize, 1)) // align * align
    tb = max(tb, align)
    return batch if batch <= tb else tb


def triplet_loss(anchor, positive, negative, margin=0.2):
    B, D = anchor.shape
    assert positive.shape == (B, D) and negative.shape == (B, D)
    itemsize = jnp.dtype(anchor.dtype).itemsize

    tb = _pick_block_rows(B, D, itemsize)
    grid = (pl.cdiv(B, tb),)

    # 3 inputs x 2 pipeline buffers + double-buffered (tb, 1) f32 output blocks.
    block_bytes = tb * D * itemsize
    vmem_needed = 3 * 2 * block_bytes + 2 * tb * 4
    vmem_limit = int(min(max(2 * vmem_needed, 32 * 1024 * 1024), 100 * 1024 * 1024))

    kernel = functools.partial(_triplet_loss_kernel, margin=float(margin))

    per_sample = pl.pallas_call(
        kernel,
        out_shape=jax.ShapeDtypeStruct((B, 1), jnp.float32),
        grid_spec=pltpu.PrefetchScalarGridSpec(
            num_scalar_prefetch=0,
            grid=grid,
            in_specs=[
                pl.BlockSpec((tb, D), lambda i: (i, 0)),
                pl.BlockSpec((tb, D), lambda i: (i, 0)),
                pl.BlockSpec((tb, D), lambda i: (i, 0)),
            ],
            out_specs=pl.BlockSpec((tb, 1), lambda i: (i, 0)),
        ),
        compiler_params=pltpu.CompilerParams(
            dimension_semantics=("parallel",),
            vmem_limit_bytes=vmem_limit,
        ),
        cost_estimate=pl.CostEstimate(
            flops=7 * B * D,
            transcendentals=0,
            bytes_accessed=3 * B * D * itemsize + B * 4,
        ),
    )(anchor, positive, negative)

    # Tiny finalize on the host-side XLA graph: mean over per-sample losses.
    return jnp.sum(per_sample) / jnp.float32(B)


def triplet_loss_ref(anchor, positive, negative, margin=0.2):
    # pure-JAX reference mirroring the PyTorch module
    pos_dist = jnp.sum((anchor - positive) ** 2, axis=1)
    neg_dist = jnp.sum((anchor - negative) ** 2, axis=1)
    loss = jnp.maximum(pos_dist - neg_dist + margin, 0.0)
    return jnp.mean(loss)


if __name__ == "__main__":
    B, D = 8, 32
    key = jax.random.PRNGKey(0)
    ka, kp, kn = jax.random.split(key, 3)
    anchor = jax.random.normal(ka, (B, D), dtype=jnp.float32)
    positive = jax.random.normal(kp, (B, D), dtype=jnp.float32)
    negative = jax.random.normal(kn, (B, D), dtype=jnp.float32)

    out = triplet_loss(anchor, positive, negative, margin=0.2)
    out = jax.block_until_ready(out)

    ref = triplet_loss_ref(anchor, positive, negative, margin=0.2)
    assert jnp.allclose(out, ref, atol=1e-5, rtol=1e-5), (out, ref)

    print("KERNEL_OK")
</pallas_src>

<mosaic_0001>
module attributes {stable_mosaic.version = 11 : i64} {
  func.func @_triplet_loss_kernel(%arg0: i32, %arg1: memref<8x32xf32, #tpu.memory_space<vmem>>, %arg2: memref<8x32xf32, #tpu.memory_space<vmem>>, %arg3: memref<8x32xf32, #tpu.memory_space<vmem>>, %arg4: memref<8x1xf32, #tpu.memory_space<vmem>>) attributes {dimension_semantics = [#tpu.dimension_semantics<parallel>], iteration_bounds = array<i64: 1>, scalar_prefetch = 0 : i64, scratch_operands = 0 : i64, tpu.core_type = #tpu.core_type<tc>, window_params = [{transform_indices = @transform_0, window_bounds = array<i64: 8, 32>}, {transform_indices = @transform_1, window_bounds = array<i64: 8, 32>}, {transform_indices = @transform_2, window_bounds = array<i64: 8, 32>}, {transform_indices = @transform_3, window_bounds = array<i64: 8, 1>}]} {
    %c0 = arith.constant 0 : index
    %c0_0 = arith.constant 0 : index
    %0 = vector.load %arg1[%c0, %c0_0] : memref<8x32xf32, #tpu.memory_space<vmem>>, vector<8x32xf32>
    %c0_1 = arith.constant 0 : index
    %c0_2 = arith.constant 0 : index
    %1 = vector.load %arg2[%c0_1, %c0_2] : memref<8x32xf32, #tpu.memory_space<vmem>>, vector<8x32xf32>
    %c0_3 = arith.constant 0 : index
    %c0_4 = arith.constant 0 : index
    %2 = vector.load %arg3[%c0_3, %c0_4] : memref<8x32xf32, #tpu.memory_space<vmem>>, vector<8x32xf32>
    %3 = arith.subf %1, %2 : vector<8x32xf32>
    %4 = arith.addf %1, %2 : vector<8x32xf32>
    %cst = arith.constant 2.000000e+00 : f32
    %5 = vector.broadcast %cst : f32 to vector<8x32xf32>
    %6 = arith.mulf %5, %0 : vector<8x32xf32>
    %7 = arith.subf %4, %6 : vector<8x32xf32>
    %8 = arith.mulf %3, %7 : vector<8x32xf32>
    %cst_5 = arith.constant dense<0.000000e+00> : vector<8xf32>
    %9 = vector.multi_reduction <add>, %8, %cst_5 [1] : vector<8x32xf32> to vector<8xf32>
    %10 = vector.shape_cast %9 : vector<8xf32> to vector<8x1xf32>
    %cst_6 = arith.constant 2.000000e-01 : f32
    %11 = vector.broadcast %cst_6 : f32 to vector<8x1xf32>
    %12 = arith.addf %10, %11 : vector<8x1xf32>
    %cst_7 = arith.constant 0.000000e+00 : f32
    %13 = vector.broadcast %cst_7 : f32 to vector<8x1xf32>
    %14 = arith.maximumf %12, %13 : vector<8x1xf32>
    %c0_8 = arith.constant 0 : index
    %c0_9 = arith.constant 0 : index
    %15 = vector.load %arg4[%c0_8, %c0_9] : memref<8x1xf32, #tpu.memory_space<vmem>>, vector<8x1xf32>
    tpu.vector_store %arg4[%c0_8, %c0_9], %14 {strides = array<i32>} : memref<8x1xf32, #tpu.memory_space<vmem>>, vector<8x1xf32>,
    return
  }
  func.func @transform_0(%arg0: i32) -> (i32, i32) {
    %c0_i32 = arith.constant 0 : i32
    %c0_i32_0 = arith.constant 0 : i32
    return %arg0, %c0_i32 : i32, i32
  }
  func.func @transform_1(%arg0: i32) -> (i32, i32) {
    %c0_i32 = arith.constant 0 : i32
    %c0_i32_0 = arith.constant 0 : i32
    return %arg0, %c0_i32 : i32, i32
  }
  func.func @transform_2(%arg0: i32) -> (i32, i32) {
    %c0_i32 = arith.constant 0 : i32
    %c0_i32_0 = arith.constant 0 : i32
    return %arg0, %c0_i32 : i32, i32
  }
  func.func @transform_3(%arg0: i32) -> (i32, i32) {
    %c0_i32 = arith.constant 0 : i32
    %c0_i32_0 = arith.constant 0 : i32
    return %arg0, %c0_i32 : i32, i32
  }
}

</mosaic_0001>

<bundles_post_ra>
// kernel: tpu_custom_call.1
= control target key start
LH: loop header
LB: loop body
LE: loop exit
PB: predicated region body
PF: predicated region fallthrough
CT: control target
= control target key end

     0   :  { %8 = vsyncpa [#allocation3], 0  ;;  %s206_s0 = inlined_call_operand.hbm [shape: f32[8,32], index: 0, kind: input, shape index: {}]   ;;  %s207_s1 = inlined_call_operand.hbm [shape: f32[8,32], index: 1, kind: input, shape index: {}]   ;;  %s208_s2 = inlined_call_operand.hbm [shape: f32[8,32], index: 2, kind: input, shape index: {}]   ;;  %s209_s3 = inlined_call_operand.vmem [shape: f32[8,1], index: 3, kind: output, shape index: {}]  }
   0x1   :  { %9 = vsyncpa [#allocation5], 0  ;;  %s144_s12 = smov [#allocation4]   ;;  %s145_s14 = smov [#allocation2]  }
   0x2   :  { %s26_s13 = sshll.u32 %s144_s12, 4  ;;  %s16_s15 = sshll.u32 %s145_s14, 4  ;;  %s27_s13 = int_to_ptr.vmem [resolvable:$true] %s26_s13  ;;  %s17_s15 = int_to_ptr.vmem [resolvable:$true] %s16_s15 }
   0x3   :  { %s74_s18 = scalar_lea.hbm %s207_s1, 128 }
   0x4   :  { %p75_p0 = scmp.ne.s32.totalorder %s207_s1, %s74_s18  ;;  %p78_p1 = scmp.lt.u32.totalorder %s74_s18, %s207_s1 }
   0x6   :  { %p80_p2 = pnand %p78_p1, %p75_p0 }
   0x8   :  { %83 = shalt.err (!%p80_p2)
}
   0x9   :  { %s84_s23 = scalar_lea.vmem %s27_s13, 128  ;;  %p89_p4 = scmp.lt.s32.totalorder %s27_s13, %s27_s13 }
   0xa   :  { %p85_p3 = scmp.ne.s32.totalorder %s27_s13, %s84_s23  ;;  %p90_p5 = scmp.lt.s32.totalorder %s84_s23, %s84_s23 }
   0xc   :  { %p91_p6 = por %p90_p5, %p89_p4 }
   0xe   :  { %p92_p7 = pnand %p91_p6, %p85_p3 }
  0x10   :  { %95 = shalt.err (!%p92_p7)
}
  0x11   :  { %29 = dma.hbm_to_vmem [thread:$0]  %s207_s1, 128, %s27_s13, [#allocation5]  }
  0x12   :  { %s96_s28 = scalar_lea.hbm %s206_s0, 128 }
  0x13   :  { %p97_p8 = scmp.ne.s32.totalorder %s206_s0, %s96_s28  ;;  %p100_p9 = scmp.lt.u32.totalorder %s96_s28, %s206_s0 }
  0x15   :  { %p102_p10 = pnand %p100_p9, %p97_p8 }
  0x17   :  { %105 = shalt.err (!%p102_p10)
}
  0x18   :  { %s106_s6 = scalar_lea.vmem %s17_s15, 128  ;;  %p111_p12 = scmp.lt.s32.totalorder %s17_s15, %s17_s15 }
  0x19   :  { %p107_p11 = scmp.ne.s32.totalorder %s17_s15, %s106_s6  ;;  %p112_p13 = scmp.lt.s32.totalorder %s106_s6, %s106_s6 }
  0x1b   :  { %p113_p0 = por %p112_p13, %p111_p12 }
  0x1d   :  { %p114_p1 = pnand %p113_p0, %p107_p11 }
  0x1f   :  { %117 = shalt.err (!%p114_p1)
}
  0x20   :  { %19 = dma.hbm_to_vmem [thread:$0]  %s206_s0, 128, %s17_s15, [#allocation3]  }
  0x21   :  { %s146_s8 = smov [#allocation6]   ;;  %s118_s12 = scalar_lea.hbm %s208_s2, 128 }
  0x22   :  { %s36_s9 = sshll.u32 %s146_s8, 4  ;;  %p119_p2 = scmp.ne.s32.totalorder %s208_s2, %s118_s12  ;;  %s37_s9 = int_to_ptr.vmem [resolvable:$true] %s36_s9 }
  0x23   :  { %p122_p3 = scmp.lt.u32.totalorder %s118_s12, %s208_s2 }
  0x25   :  { %p124_p4 = pnand %p122_p3, %p119_p2 }
  0x27   :  { %127 = shalt.err (!%p124_p4)
}
  0x28   :  { %s128_s18 = scalar_lea.vmem %s37_s9, 128  ;;  %p133_p6 = scmp.lt.s32.totalorder %s37_s9, %s37_s9 }
  0x29   :  { %p129_p5 = scmp.ne.s32.totalorder %s37_s9, %s128_s18  ;;  %p134_p7 = scmp.lt.s32.totalorder %s128_s18, %s128_s18 }
  0x2b   :  { %p135_p8 = por %p134_p7, %p133_p6 }
  0x2d   :  { %p136_p9 = pnand %p135_p8, %p129_p5 }
  0x2f   :  { %139 = shalt.err (!%p136_p9)
}
  0x30   :  { %39 = dma.hbm_to_vmem [thread:$0]  %s208_s2, 128, %s37_s9, [#allocation5]  }
  0x31   :  { %140 = dma.done.wait [#allocation3], 128  }
  0x32   :  { %141 = vsyncadd [#allocation3], 4294967168 }
  0x33   :  { %142 = dma.done.wait [#allocation5], 256  }
  0x34   :  { %143 = vsyncadd [#allocation5], 4294967040  ;;  %v49_v0 = vld [vmem:[#allocation2] sm:$0xff]  ;;  %v50_v1 = vld [vmem:[#allocation4] sm:$0xff]  ;;  %vm57_vm0 = vcmask 261120   ;;  %vm63_vm1 = vcmask 7168  }
  0x35   :  { %v51_v2 = vld [vmem:[#allocation6] sm:$0xff]  ;;  %v54_v5 = vmul.f32 2.0, %v49_v0 }
  0x36   :  { %v52_v3 = vsub.f32 %v50_v1, %v51_v2  ;;  %v53_v4 = vadd.f32 %v51_v2, %v50_v1 }
  0x38   :  { %v55_v6 = vsub.f32 %v53_v4, %v54_v5 }
  0x3a   :  { %v56_v7 = vmul.f32 %v55_v6, %v52_v3 }
  0x3c   :  { %v58_v8 = vsel %vm57_vm0, %v56_v7, 0.0 }
  0x3d   :  { %59 = vadd.xlane.f32.xlu0 %v58_v8 }
  0xca   :  { %v60_v9 = vpop.xlane.xlu0 %59 }
  0xcb   :  { %v61_v10 = vadd.f32 0.2, %v60_v9 }
  0xcd   :  { %v62_v11 = vmax.f32 %v61_v10, 0.0 }
  0xcf   :  { %64 = vst.msk [vmem:[%s209_s3] sm:$0xff] %vm63_vm1, %v62_v11 }
  0xd0   :  { %69 = vsyncpa [#allocation3], 1 }
  0xd1   :  { %70 = vsyncpa [#allocation5], 1 }

</bundles_post_ra>
